<compile_context>
chip_gen: v7x
topology: tpu7x:2x2x1
jax: 0.10.0
libtpu: 0.0.40
codegen_flags: <defaults>
</compile_context>

<pallas_src>
import jax
import jax.numpy as jnp
from jax.experimental import pallas as pl
from jax.experimental.pallas import tpu as pltpu


def _affine_kernel(x_ref, o_ref):
    # (x + 2) * 3 - 5/2 folded to 3*x + 3.5: 2 VPU ops per vreg instead of 3.
    o_ref[...] = x_ref[...] * 3.0 + 3.5


# ~2 MiB per input tile: measured plateau of HBM roofline efficiency, and
# 2 buffers x (input + output) = 8 MiB resident -> fits every generation's
# default scoped VMEM (v5e 16 MiB, v6e 32 MiB, v7x 32 MiB-of-64 MiB).
_TARGET_TILE_BYTES = 2 * 1024 * 1024


def _choose_cols(n):
    # Largest lane-dense width that divides n exactly (no padding needed).
    for c in (2048, 1024, 512, 256, 128):
        if n % c == 0:
            return c
    return None


def pt_module_forward(x):
    """Pallas implementation of PtModule.forward: (x + 2) * 3 - 5/2."""
    orig_shape = x.shape

    # PyTorch semantics: the `- 5/2` (== 2.5) promotes integer inputs to float;
    # float inputs keep their dtype.
    if jnp.issubdtype(x.dtype, jnp.floating):
        out_dtype = x.dtype
    else:
        out_dtype = jnp.float32
    xf = x.astype(out_dtype)

    n = xf.size
    if n == 0:
        return xf.reshape(orig_shape)

    cols = _choose_cols(n)
    if cols is None:
        # Element count not a multiple of 128: a Pallas layout would need a
        # whole-array pad + trailing slice (two extra HBM passes on a mem-bound
        # op). Let XLA fuse the trivial affine op instead.
        return (xf * 3.0 + 3.5).reshape(orig_shape)

    rows = n // cols
    x2d = xf.reshape(rows, cols)  # contiguous reshape: free, no HBM copy
    itemsize = jnp.dtype(out_dtype).itemsize

    if rows * cols * itemsize <= _TARGET_TILE_BYTES:
        # Small-input fast path: single block covering the whole array,
        # no grid-step overhead, no padding.
        out2d = pl.pallas_call(
            _affine_kernel,
            out_shape=jax.ShapeDtypeStruct((rows, cols), out_dtype),
        )(x2d)
        return out2d.reshape(orig_shape)

    # Tiled path: lane-dense blocks (cols is a multiple of 128 -> unmasked vst),
    # rows tiled so each block is ~2 MiB. The partial edge block along rows is
    # masked by Pallas (OOB reads are garbage but harmless for an elementwise
    # op; OOB writes are dropped) -> no jnp.pad, no trailing slice.
    tile_r = max(8, (_TARGET_TILE_BYTES // (cols * itemsize)) // 8 * 8)
    tile_r = min(tile_r, ((rows + 7) // 8) * 8)

    grid = (pl.cdiv(rows, tile_r),)

    out2d = pl.pallas_call(
        _affine_kernel,
        out_shape=jax.ShapeDtypeStruct((rows, cols), out_dtype),
        grid_spec=pltpu.PrefetchScalarGridSpec(
            num_scalar_prefetch=0,
            grid=grid,
            in_specs=[pl.BlockSpec((tile_r, cols), lambda i: (i, 0))],
            out_specs=pl.BlockSpec((tile_r, cols), lambda i: (i, 0)),
        ),
        compiler_params=pltpu.CompilerParams(
            dimension_semantics=("parallel",),  # megacore-shardable on v7x
        ),
    )(x2d)

    return out2d.reshape(orig_shape)


if __name__ == "__main__":
    key = jax.random.PRNGKey(0)

    # 1) Small shape consistent with a generic tensor input (single-block path).
    x_small = jax.random.normal(key, (2, 4, 16, 16), dtype=jnp.float32)
    y_small = pt_module_forward(x_small)
    jax.block_until_ready(y_small)
    y_small_ref = (x_small + 2.0) * 3.0 - 2.5
    assert jnp.allclose(y_small, y_small_ref, atol=1e-5, rtol=1e-5), \
        "small-path mismatch vs reference"

    # 2) Slightly larger input to exercise the tiled path + masked edge block.
    k2 = jax.random.PRNGKey(1)
    x_big = jax.random.normal(k2, (7, 1024, 128), dtype=jnp.float32)
    y_big = pt_module_forward(x_big)
    jax.block_until_ready(y_big)
    y_big_ref = (x_big + 2.0) * 3.0 - 2.5
    assert jnp.allclose(y_big, y_big_ref, atol=1e-5, rtol=1e-5), \
        "tiled-path mismatch vs reference"

    print("KERNEL_OK")
</pallas_src>

<mosaic_0001>
module attributes {stable_mosaic.version = 11 : i64} {
  func.func @_affine_kernel(%arg0: memref<1x2048xf32, #tpu.memory_space<vmem>>, %arg1: memref<1x2048xf32, #tpu.memory_space<vmem>>) attributes {dimension_semantics = [], scalar_prefetch = 0 : i64, scratch_operands = 0 : i64, tpu.core_type = #tpu.core_type<tc>} {
    %c0 = arith.constant 0 : index
    %c0_0 = arith.constant 0 : index
    %0 = vector.load %arg0[%c0, %c0_0] : memref<1x2048xf32, #tpu.memory_space<vmem>>, vector<1x2048xf32>
    %cst = arith.constant 3.000000e+00 : f32
    %1 = vector.broadcast %cst : f32 to vector<1x2048xf32>
    %2 = arith.mulf %0, %1 : vector<1x2048xf32>
    %cst_1 = arith.constant 3.500000e+00 : f32
    %3 = vector.broadcast %cst_1 : f32 to vector<1x2048xf32>
    %4 = arith.addf %2, %3 : vector<1x2048xf32>
    %c0_2 = arith.constant 0 : index
    %c0_3 = arith.constant 0 : index
    %5 = vector.load %arg1[%c0_2, %c0_3] : memref<1x2048xf32, #tpu.memory_space<vmem>>, vector<1x2048xf32>
    tpu.vector_store %arg1[%c0_2, %c0_3], %4 {strides = array<i32>} : memref<1x2048xf32, #tpu.memory_space<vmem>>, vector<1x2048xf32>,
    return
  }
}

</mosaic_0001>

<bundles_post_ra>
// kernel: tpu_custom_call.1
= control target key start
LH: loop header
LB: loop body
LE: loop exit
PB: predicated region body
PF: predicated region fallthrough
CT: control target
= control target key end

     0   :  { %6 = vsyncpa [#allocation3], 0  ;;  %s130_s0 = inlined_call_operand.hbm [shape: f32[1,2048], index: 0, kind: input, shape index: {}]   ;;  %s131_s1 = inlined_call_operand.hbm [shape: f32[1,2048], index: 1, kind: output, shape index: {}]  }
   0x1   :  { %7 = vsyncpa [#allocation4], 0  ;;  %s94_s6 = smov [#allocation2]   ;;  %s46_s10 = scalar_lea.hbm %s130_s0, 256 }
   0x2   :  { %s14_s7 = sshll.u32 %s94_s6, 4  ;;  %p47_p0 = scmp.ne.s32.totalorder %s130_s0, %s46_s10  ;;  %s15_s7 = int_to_ptr.vmem [resolvable:$true] %s14_s7 }
   0x3   :  { %p50_p1 = scmp.lt.u32.totalorder %s46_s10, %s130_s0 }
   0x5   :  { %p52_p2 = pnand %p50_p1, %p47_p0 }
   0x7   :  { %55 = shalt.err (!%p52_p2)
}
   0x8   :  { %s56_s15 = scalar_lea.vmem %s15_s7, 256  ;;  %p61_p4 = scmp.lt.s32.totalorder %s15_s7, %s15_s7 }
   0x9   :  { %p57_p3 = scmp.ne.s32.totalorder %s15_s7, %s56_s15  ;;  %p62_p5 = scmp.lt.s32.totalorder %s56_s15, %s56_s15 }
   0xb   :  { %p63_p6 = por %p62_p5, %p61_p4 }
   0xd   :  { %p64_p7 = pnand %p63_p6, %p57_p3 }
   0xf   :  { %67 = shalt.err (!%p64_p7)
}
  0x10   :  { %17 = dma.hbm_to_vmem [thread:$0]  %s130_s0, 256, %s15_s7, [#allocation3]  }
  0x11   :  { %90 = dma.done.wait [#allocation3], 256  }
  0x12   :  { %91 = vsyncadd [#allocation3], 4294967040  ;;  %v21_v0 = vld [vmem:[#allocation2] sm:$0xff]  ;;  %v22_v1 = vld [vmem:[#allocation2 + $0x8] sm:$0xff]  ;;  %s95_s18 = smov [#allocation5]  }
  0x13   :  { %s35_s19 = sshll.u32 %s95_s18, 4  ;;  %v23_v2 = vmul.f32 3.0, %v21_v0  ;;  %v24_v3 = vmul.f32 3.0, %v22_v1  ;;  %s36_s19 = int_to_ptr.vmem [resolvable:$true] %s35_s19 }
  0x14   :  { %s68_s20 = scalar_lea.vmem %s36_s19, 256  ;;  %p73_p9 = scmp.lt.s32.totalorder %s36_s19, %s36_s19 }
  0x15   :  { %v25_v4 = vadd.f32 3.5, %v23_v2  ;;  %v26_v5 = vadd.f32 3.5, %v24_v3  ;;  %p69_p8 = scmp.ne.s32.totalorder %s36_s19, %s68_s20  ;;  %p74_p10 = scmp.lt.s32.totalorder %s68_s20, %s68_s20 }
  0x17   :  { %27 = vst [vmem:[#allocation5] sm:$0xff] %v25_v4  ;;  %28 = vst [vmem:[#allocation5 + $0x8] sm:$0xff] %v26_v5  ;;  %p75_p11 = por %p74_p10, %p73_p9 }
  0x19   :  { %p76_p12 = pnand %p75_p11, %p69_p8 }
  0x1b   :  { %79 = shalt.err (!%p76_p12)
}
  0x1c   :  { %s80_s22 = scalar_lea.hbm %s131_s1, 256 }
  0x1d   :  { %p81_p13 = scmp.ne.s32.totalorder %s131_s1, %s80_s22  ;;  %p84_p0 = scmp.lt.u32.totalorder %s80_s22, %s131_s1 }
  0x1f   :  { %p86_p1 = pnand %p84_p0, %p81_p13 }
  0x21   :  { %89 = shalt.err (!%p86_p1)
}
  0x22   :  { %38 = dma.vmem_to_hbm [thread:$0]  %s36_s19, 256, %s131_s1, [#allocation4]  }
  0x23   :  { %92 = dma.done.wait [#allocation4], 256  }
  0x24   :  { %93 = vsyncadd [#allocation4], 4294967040 }
  0x25   :  { %42 = vsyncpa [#allocation3], 1 }
  0x26   :  { %43 = vsyncpa [#allocation4], 1 }

</bundles_post_ra>
